<compile_context>
chip_gen: v5e
topology: v5e:2x2
jax: 0.10.0
libtpu: 0.0.40
codegen_flags: <defaults>
</compile_context>

<pallas_src>
import functools

import jax
import jax.numpy as jnp
from jax import lax
from jax.experimental import pallas as pl
from jax.experimental.pallas import tpu as pltpu


def _vmem_budget_bytes():
    """Per-generation VMEM budget: ~0.75 of physical capacity."""
    try:
        cap = pltpu.get_tpu_info().vmem_capacity_bytes
    except Exception:
        cap = 64 * 1024 * 1024  # conservative fallback (v7x physical per-TC VMEM)
    return int(0.75 * cap)


def _gram_loss_kernel(s_ref, t_ref, o_ref, acc_ref, *, col_tile, cast_bf16):
    j = pl.program_id(0)                 # Gram column block (parallel)
    i = pl.program_id(1)                 # batch tile (arbitrary / reduction)
    full_d = s_ref.shape[1]              # static

    s = s_ref[...]
    t = t_ref[...]

    if col_tile == full_d:
        s_cols, t_cols = s, t
    else:
        # col_tile is guaranteed to be a multiple of 128 (lane-aligned slice).
        col0 = pl.multiple_of(j * col_tile, 128)
        s_cols = s_ref[:, pl.ds(col0, col_tile)]
        t_cols = t_ref[:, pl.ds(col0, col_tile)]

    if cast_bf16:
        s = s.astype(jnp.bfloat16)
        t = t.astype(jnp.bfloat16)
        s_cols = s_cols.astype(jnp.bfloat16)
        t_cols = t_cols.astype(jnp.bfloat16)

    # Fused Gram difference: [s; -t]^T @ [s_cols; t_cols] = s^T s_c - t^T t_c.
    lhs = jnp.concatenate([s, -t], axis=0)            # (2*bt, D)
    rhs = jnp.concatenate([s_cols, t_cols], axis=0)   # (2*bt, col_tile)
    dn = (((0,), (0,)), ((), ()))                     # contract leading axis
    res = lax.dot_general(lhs, rhs, dimension_numbers=dn,
                          preferred_element_type=jnp.float32)  # (D, col_tile)

    @pl.when(i == 0)
    def _():
        acc_ref[...] = res                # fold away separate zero-init

    @pl.when(i > 0)
    def _():
        acc_ref[...] += res

    @pl.when(i == pl.num_programs(1) - 1)
    def _():
        # acc = B * (G_s - G_t)[:, cols]; emit the partial sum of squares.
        d = acc_ref[...]
        sq = d * d
        m = jnp.sum(sq, axis=1, keepdims=True)   # (D, 1)
        m = jnp.sum(m, axis=0, keepdims=True)    # (1, 1)
        o_ref[...] = m.reshape(1, 1, 1)


def _default_col_tile(D, budget):
    """Column-block width for the (D, col_tile) accumulator."""
    # acc + one f32 matmul-result temp: 8 bytes per accumulator element.
    if 8 * D * D <= budget // 2:
        return D
    if D % 128 != 0:
        # TODO(synk): no lane-aligned divisor; fall back to full width.
        return D
    cap = max(128, budget // (16 * D))
    best = 128
    tn = 128
    while tn <= min(D, cap):
        if D % tn == 0:
            best = tn
        tn += 128
    return best


def _default_batch_tile(B, D, col_tile, in_itemsize, mxu_itemsize, budget):
    """Largest layout-legal divisor of B that fits the VMEM budget."""
    sublane = {4: 8, 2: 16, 1: 32}.get(mxu_itemsize, 8)
    fixed = 8 * D * col_tile                       # f32 accumulator + result temp
    # per batch-row: 2 inputs x 2 pipeline buffers + concat lhs/rhs temps.
    per_row = 4 * D * in_itemsize + (3 * D + 2 * col_tile) * mxu_itemsize
    avail = max(budget - fixed, 8 * per_row)
    cap = int(min(B, 4096, max(8, avail // per_row)))

    best_sub = None   # multiple of the packed-dtype sublane count
    best_8 = None     # multiple of 8 (layout-legal second-to-last block dim)
    for t in range(8, cap + 1, 8):
        if B % t == 0:
            best_8 = t
            if t % sublane == 0:
                best_sub = t
    if best_sub is not None:
        return best_sub
    if best_8 is not None:
        return best_8
    # TODO(synk): odd batch sizes fall back to a single full-array block; a
    # padded/masked tail tile is not implemented.
    return B


def transfer_loss_gram(source, target, *, batch_tile=None, col_tile=None,
                       cast_to_bf16=False):
    """Pallas implementation of TransferLoss(loss_type='gram')(source, target).

    source, target: (B, D) feature matrices (same shape, same dtype).
    Returns a scalar float32 loss.
    """
    assert source.ndim == 2 and source.shape == target.shape
    assert source.dtype == target.dtype
    B, D = source.shape

    budget = _vmem_budget_bytes()
    in_itemsize = jnp.dtype(source.dtype).itemsize
    cast_bf16 = bool(cast_to_bf16) and source.dtype == jnp.float32
    mxu_itemsize = 2 if (cast_bf16 or in_itemsize == 2) else in_itemsize

    if col_tile is None:
        col_tile = _default_col_tile(D, budget)
    assert D % col_tile == 0, (D, col_tile)
    assert col_tile == D or col_tile % 128 == 0, col_tile
    if batch_tile is None:
        batch_tile = _default_batch_tile(B, D, col_tile, in_itemsize,
                                         mxu_itemsize, budget)
    assert B % batch_tile == 0, (B, batch_tile)

    J = D // col_tile
    NB = B // batch_tile
    grid = (J, NB)

    kernel = functools.partial(_gram_loss_kernel, col_tile=col_tile,
                               cast_bf16=cast_bf16)

    partials = pl.pallas_call(
        kernel,
        out_shape=jax.ShapeDtypeStruct((J, 1, 1), jnp.float32),
        grid_spec=pltpu.PrefetchScalarGridSpec(
            num_scalar_prefetch=0,
            grid=grid,
            in_specs=[
                pl.BlockSpec((batch_tile, D), lambda j, i: (i, 0)),
                pl.BlockSpec((batch_tile, D), lambda j, i: (i, 0)),
            ],
            out_specs=pl.BlockSpec((1, 1, 1), lambda j, i: (j, 0, 0)),
            scratch_shapes=[
                pltpu.VMEM((D, col_tile), jnp.float32),  # difference accumulator
            ],
        ),
        compiler_params=pltpu.CompilerParams(
            dimension_semantics=("parallel", "arbitrary"),
            vmem_limit_bytes=budget,
        ),
    )(source, target)

    # acc = B * (G_s - G_t); fold 1/B and the mean's 1/D^2 into one scale.
    scale = 1.0 / (float(B) * float(B) * float(D) * float(D))
    return jnp.sum(partials) * scale


def _reference_gram_loss(source, target):
    B = source.shape[0]
    s = source.astype(jnp.float32)
    t = target.astype(jnp.float32)
    gs = s.T @ s / B
    gt = t.T @ t / B
    return jnp.mean((gs - gt) ** 2)


if __name__ == "__main__":
    key = jax.random.PRNGKey(0)
    k1, k2, k3, k4, k5, k6 = jax.random.split(key, 6)

    # Test 1: small shape, single grid step (block == full array).
    B, D = 8, 32
    source = jax.random.normal(k1, (B, D), dtype=jnp.float32)
    target = jax.random.normal(k2, (B, D), dtype=jnp.float32) + 0.1
    loss = jax.block_until_ready(transfer_loss_gram(source, target))
    ref = _reference_gram_loss(source, target)
    assert jnp.allclose(loss, ref, rtol=1e-5, atol=1e-6), (loss, ref)

    # Test 2: multi-tile batch axis to exercise the carried accumulator.
    B2, D2 = 64, 128
    source2 = jax.random.normal(k3, (B2, D2), dtype=jnp.float32)
    target2 = jax.random.normal(k4, (B2, D2), dtype=jnp.float32) + 0.05
    loss2 = jax.block_until_ready(
        transfer_loss_gram(source2, target2, batch_tile=16))
    ref2 = _reference_gram_loss(source2, target2)
    assert jnp.allclose(loss2, ref2, rtol=1e-5, atol=1e-6), (loss2, ref2)

    # Test 3: column-tiled accumulator + parallel Gram-column grid axis.
    B3, D3 = 32, 256
    source3 = jax.random.normal(k5, (B3, D3), dtype=jnp.float32)
    target3 = jax.random.normal(k6, (B3, D3), dtype=jnp.float32) - 0.05
    loss3 = jax.block_until_ready(
        transfer_loss_gram(source3, target3, batch_tile=16, col_tile=128))
    ref3 = _reference_gram_loss(source3, target3)
    assert jnp.allclose(loss3, ref3, rtol=1e-4, atol=1e-6), (loss3, ref3)

    print("KERNEL_OK")
</pallas_src>

<mosaic_0001>
module attributes {stable_mosaic.version = 11 : i64} {
  func.func @_gram_loss_kernel(%arg0: i32, %arg1: i32, %arg2: memref<8x32xf32, #tpu.memory_space<vmem>>, %arg3: memref<8x32xf32, #tpu.memory_space<vmem>>, %arg4: memref<1x1x1xf32, #tpu.memory_space<vmem>>, %arg5: memref<32x32xf32, #tpu.memory_space<vmem>>) attributes {dimension_semantics = [#tpu.dimension_semantics<parallel>, #tpu.dimension_semantics<arbitrary>], iteration_bounds = array<i64: 1, 1>, scalar_prefetch = 0 : i64, scratch_operands = 1 : i64, tpu.core_type = #tpu.core_type<tc>, window_params = [{transform_indices = @transform_0, window_bounds = array<i64: 8, 32>}, {transform_indices = @transform_1, window_bounds = array<i64: 8, 32>}, {transform_indices = @transform_2, window_bounds = array<i64: 1, 1, 1>}]} {
    %c0 = arith.constant 0 : index
    %c0_0 = arith.constant 0 : index
    %0 = vector.load %arg2[%c0, %c0_0] : memref<8x32xf32, #tpu.memory_space<vmem>>, vector<8x32xf32>
    %c0_1 = arith.constant 0 : index
    %c0_2 = arith.constant 0 : index
    %1 = vector.load %arg3[%c0_1, %c0_2] : memref<8x32xf32, #tpu.memory_space<vmem>>, vector<8x32xf32>
    %cst = arith.constant 0.000000e+00 : f32
    %2 = vector.broadcast %cst : f32 to vector<8x32xf32>
    %3 = arith.subf %2, %1 : vector<8x32xf32>
    %4 = tpu.concatenate %0, %3 in 0 : vector<8x32xf32>, vector<8x32xf32> -> vector<16x32xf32>
    %5 = tpu.concatenate %0, %1 in 0 : vector<8x32xf32>, vector<8x32xf32> -> vector<16x32xf32>
    %cst_3 = arith.constant dense<0.000000e+00> : vector<32x32xf32>
    %6 = tpu.matmul %4, %5, %cst_3 {dimension_numbers = #tpu.dot_dimension_numbers<[0], [0], [1], [1], [0, 1, 1, 1], [], []>} : vector<16x32xf32>, vector<16x32xf32>, vector<32x32xf32> -> vector<32x32xf32>
    %c0_i32 = arith.constant 0 : i32
    %7 = arith.cmpi eq, %arg1, %c0_i32 : i32
    %8 = arith.extui %7 : i1 to i32
    %c0_i32_4 = arith.constant 0 : i32
    %9 = arith.cmpi ne, %8, %c0_i32_4 : i32
    scf.if %9 {
      %c0_9 = arith.constant 0 : index
      %c0_10 = arith.constant 0 : index
      %16 = vector.load %arg5[%c0_9, %c0_10] : memref<32x32xf32, #tpu.memory_space<vmem>>, vector<32x32xf32>
      tpu.vector_store %arg5[%c0_9, %c0_10], %6 {strides = array<i32>} : memref<32x32xf32, #tpu.memory_space<vmem>>, vector<32x32xf32>,
    } else {
    }
    %c0_i32_5 = arith.constant 0 : i32
    %10 = arith.cmpi sgt, %arg1, %c0_i32_5 : i32
    %11 = arith.extui %10 : i1 to i32
    %c0_i32_6 = arith.constant 0 : i32
    %12 = arith.cmpi ne, %11, %c0_i32_6 : i32
    scf.if %12 {
      %c0_9 = arith.constant 0 : index
      %c0_10 = arith.constant 0 : index
      %16 = vector.load %arg5[%c0_9, %c0_10] : memref<32x32xf32, #tpu.memory_space<vmem>>, vector<32x32xf32>
      %17 = arith.addf %16, %6 : vector<32x32xf32>
      %c0_11 = arith.constant 0 : index
      %c0_12 = arith.constant 0 : index
      %18 = vector.load %arg5[%c0_11, %c0_12] : memref<32x32xf32, #tpu.memory_space<vmem>>, vector<32x32xf32>
      tpu.vector_store %arg5[%c0_11, %c0_12], %17 {strides = array<i32>} : memref<32x32xf32, #tpu.memory_space<vmem>>, vector<32x32xf32>,
    } else {
    }
    %c0_i32_7 = arith.constant 0 : i32
    %13 = arith.cmpi eq, %arg1, %c0_i32_7 : i32
    %14 = arith.extui %13 : i1 to i32
    %c0_i32_8 = arith.constant 0 : i32
    %15 = arith.cmpi ne, %14, %c0_i32_8 : i32
    scf.if %15 {
      %c0_9 = arith.constant 0 : index
      %c0_10 = arith.constant 0 : index
      %16 = vector.load %arg5[%c0_9, %c0_10] : memref<32x32xf32, #tpu.memory_space<vmem>>, vector<32x32xf32>
      %17 = arith.mulf %16, %16 : vector<32x32xf32>
      %cst_11 = arith.constant dense<0.000000e+00> : vector<32xf32>
      %18 = vector.multi_reduction <add>, %17, %cst_11 [1] : vector<32x32xf32> to vector<32xf32>
      %19 = vector.shape_cast %18 : vector<32xf32> to vector<32x1xf32>
      %cst_12 = arith.constant dense<0.000000e+00> : vector<1xf32>
      %20 = vector.multi_reduction <add>, %19, %cst_12 [0] : vector<32x1xf32> to vector<1xf32>
      %21 = vector.shape_cast %20 : vector<1xf32> to vector<1x1xf32>
      %22 = vector.shape_cast %21 : vector<1x1xf32> to vector<1x1x1xf32>
      %c0_13 = arith.constant 0 : index
      %c0_14 = arith.constant 0 : index
      %c0_15 = arith.constant 0 : index
      %23 = vector.load %arg4[%c0_13, %c0_14, %c0_15] : memref<1x1x1xf32, #tpu.memory_space<vmem>>, vector<1x1x1xf32>
      tpu.vector_store %arg4[%c0_13, %c0_14, %c0_15], %22 {strides = array<i32>} : memref<1x1x1xf32, #tpu.memory_space<vmem>>, vector<1x1x1xf32>,
    } else {
    }
    return
  }
  func.func @transform_0(%arg0: i32, %arg1: i32) -> (i32, i32) {
    %c0_i32 = arith.constant 0 : i32
    %c0_i32_0 = arith.constant 0 : i32
    return %arg1, %c0_i32 : i32, i32
  }
  func.func @transform_1(%arg0: i32, %arg1: i32) -> (i32, i32) {
    %c0_i32 = arith.constant 0 : i32
    %c0_i32_0 = arith.constant 0 : i32
    return %arg1, %c0_i32 : i32, i32
  }
  func.func @transform_2(%arg0: i32, %arg1: i32) -> (i32, i32, i32) {
    %c0_i32 = arith.constant 0 : i32
    %c0_i32_0 = arith.constant 0 : i32
    %c0_i32_1 = arith.constant 0 : i32
    return %arg0, %c0_i32, %c0_i32_0 : i32, i32, i32
  }
}

</mosaic_0001>

<bundles_post_ra>
// kernel: tpu_custom_call.1
= control target key start
LH: loop header
LB: loop body
LE: loop exit
PB: predicated region body
PF: predicated region fallthrough
CT: control target
= control target key end

     0   :  { %7 = vsyncpa [#allocation4], 0  ;;  %s323_s0 = inlined_call_operand.hbm [shape: f32[8,32], index: 0, kind: input, shape index: {}]   ;;  %s324_s1 = inlined_call_operand.hbm [shape: f32[8,32], index: 1, kind: input, shape index: {}]   ;;  %s325_s2 = inlined_call_operand.hbm [shape: f32[1,1,1], index: 2, kind: output, shape index: {}]  }
   0x1   :  { %8 = vsyncpa [#allocation7], 0 }
   0x2   :  { %9 = vsyncpa [#allocation5], 0  ;;  %s15_s11 = sshll.u32 %s323_s0, 4  ;;  %s288_s12 = smov [#allocation3]   ;;  %s16_s11 = int_to_ptr.hbm [resolvable:$true] %s15_s11 }
   0x3   :  { %s17_s13 = sshll.u32 %s288_s12, 4  ;;  %s26_s16 = sshll.u32 %s324_s1, 4  ;;  %s18_s13 = int_to_ptr.vmem [resolvable:$true] %s17_s13  ;;  %s27_s16 = int_to_ptr.hbm [resolvable:$true] %s26_s16 }
   0x4   :  { %20 = dma.hbm_to_vmem [thread:$0]  %s16_s11, 128, %s18_s13, [#allocation4]  }
   0x5   :  { %s289_s17 = smov [#allocation6]  }
   0x6   :  { %s28_s18 = sshll.u32 %s289_s17, 4  ;;  %s29_s18 = int_to_ptr.vmem [resolvable:$true] %s28_s18 }
   0x7   :  { %31 = dma.hbm_to_vmem [thread:$0]  %s27_s16, 128, %s29_s18, [#allocation7]  }
   0x8   :  { %282 = dma.done.wait [#allocation4], 128  }
   0x9   :  { %283 = vsyncadd [#allocation4], 4294967168 }
   0xa   :  { %284 = dma.done.wait [#allocation7], 128  }
   0xb   :  { %285 = vsyncadd [#allocation7], 4294967168  ;;  %v40_v0 = vld [vmem:[#allocation3] sm:$0xff]  ;;  %v41_v1 = vld [vmem:[#allocation6] sm:$0xff]  ;;  %vm75_vm0 = vcmask 130048   ;;  %vm121_vm1 = vcmask 261120  }
   0xc   :  { %43 = vxpose.xlu0.b32.start [1/2] (short) (narrow) %v40_v0, 32  ;;  %102 = vmatpush.msra.mxu0 %v41_v1  ;;  %v42_v2 = vsub.f32 0.0, %v41_v1  ;;  %s290_s0 = smov [#allocation8]   ;;  %s185_s21 = sshll.u32 %s325_s2, 4  ;;  %vm176_vm2 = vcmask 0   ;;  %s186_s21 = int_to_ptr.hbm [resolvable:$true] %s185_s21 }
   0xd   :  { %200 = vmatpush.msra.mxu1 %v41_v1  ;;  %201 = vmatpush.msra.mxu2 %v41_v1  ;;  %s183_s1 = sshll.u32 %s290_s0, 4  ;;  %s184_s1 = int_to_ptr.vmem [resolvable:$true] %s183_s1 }
   0xe   :  { %103 = vmatpush.msra.mxu0 %v40_v0  ;;  %202 = vmatpush.msra.mxu3 %v41_v1 }
   0xf   :  { %203 = vmatpush.msra.mxu1 %v40_v0  ;;  %204 = vmatpush.msra.mxu2 %v40_v0 }
  0x10   :  { %205 = vmatpush.msra.mxu3 %v40_v0 }
  0x14   :  { %44 = vxpose.xlu0.b32.end [2/2] (short) (narrow) %v42_v2, 32 }
  0xb0   :  { %v59_v3 = vpop.trf.xlu0 }
  0xb1   :  { %196 = vmatmul.msk.f32.vlgmr.msra.gmra.mxu0 %vm75_vm0, %v59_v3 }
  0xb8   :  { %v60_v4 = vpop.trf.xlu0 }
  0xb9   :  { %197 = vmatmul.msk.f32.vlgmr.msra.gmra.mxu1 %vm75_vm0, %v60_v4 }
  0xc0   :  { %v61_v5 = vpop.trf.xlu0 }
  0xc1   :  { %198 = vmatmul.msk.f32.vlgmr.msra.gmra.mxu2 %vm75_vm0, %v61_v5 }
  0xc8   :  { %v62_v6 = vpop.trf.xlu0 }
  0xc9   :  { %199 = vmatmul.msk.f32.vlgmr.msra.gmra.mxu3 %vm75_vm0, %v62_v6 }
 0x12e   :  { %v105_v7 = vpop.f32.mrf.mxu0 }
 0x12f   :  { %122 = vst.msk [vmem:[#allocation2] sm:$0xff] %vm121_vm1, %v105_v7 }
 0x136   :  { %v108_v8 = vpop.f32.mrf.mxu1  ;;  %v146_v9 = vld [vmem:[#allocation2] sm:$0xff] }
 0x137   :  { %123 = vst.msk [vmem:[#allocation2 + $0x8] sm:$0xff] %vm121_vm1, %v108_v8  ;;  %v150_v10 = vmul.f32 %v146_v9, %v146_v9 }
 0x139   :  { %v155_v11 = vsel %vm121_vm1, %v150_v10, 0.0 }
 0x13a   :  { %156 = vadd.xlane.f32.xlu1 %v155_v11 }
 0x13e   :  { %v147_v12 = vld [vmem:[#allocation2 + $0x8] sm:$0xff] }
 0x13f   :  { %v151_v13 = vmul.f32 %v147_v12, %v147_v12 }
 0x141   :  { %v158_v14 = vsel %vm121_vm1, %v151_v13, 0.0 }
 0x142   :  { %159 = vadd.xlane.f32.xlu1 %v158_v14 }
 0x144   :  { %v111_v15 = vpop.f32.mrf.mxu2 }
 0x145   :  { %124 = vst.msk [vmem:[#allocation2 + $0x10] sm:$0xff] %vm121_vm1, %v111_v15 }
 0x14c   :  { %v114_v16 = vpop.f32.mrf.mxu3  ;;  %v148_v17 = vld [vmem:[#allocation2 + $0x10] sm:$0xff] }
 0x14d   :  { %125 = vst.msk [vmem:[#allocation2 + $0x18] sm:$0xff] %vm121_vm1, %v114_v16  ;;  %v152_v18 = vmul.f32 %v148_v17, %v148_v17 }
 0x14f   :  { %v161_v19 = vsel %vm121_vm1, %v152_v18, 0.0 }
 0x150   :  { %162 = vadd.xlane.f32.xlu2 %v161_v19 }
 0x154   :  { %v149_v20 = vld [vmem:[#allocation2 + $0x18] sm:$0xff] }
 0x155   :  { %v153_v21 = vmul.f32 %v149_v20, %v149_v20 }
 0x157   :  { %v164_v22 = vsel %vm121_vm1, %v153_v21, 0.0 }
 0x158   :  { %165 = vadd.xlane.f32.xlu2 %v164_v22 }
 0x1ad   :  { %v157_v23 = vpop.xlane.xlu1 %156 }
 0x1b5   :  { %v160_v25 = vpop.xlane.xlu1 %159 }
 0x1b6   :  { %v167_v26 = vadd.f32 %v160_v25, %v157_v23 }
 0x1c3   :  { %v163_v24 = vpop.xlane.xlu2 %162 }
 0x1c4   :  { %v168_v27 = vadd.f32 %v167_v26, %v163_v24 }
 0x1cb   :  { %v166_v28 = vpop.xlane.xlu2 %165 }
 0x1cc   :  { %v169_v29 = vadd.f32 %v168_v27, %v166_v28 }
 0x1ce   :  { %v170_v30 = vrot.slane %v169_v29, 4 }
 0x1d0   :  { %v171_v31 = vadd.f32 %v170_v30, %v169_v29 }
 0x1d2   :  { %v172_v32 = vrot.slane %v171_v31, 2 }
 0x1d4   :  { %v173_v33 = vadd.f32 %v172_v32, %v171_v31 }
 0x1d6   :  { %v174_v34 = vrot.slane %v173_v33, 1 }
 0x1d8   :  { %v175_v35 = vadd.f32 %v174_v34, %v173_v33 }
 0x1da   :  { %177 = vst.msk [vmem:[#allocation8] sm:$0x1] %vm176_vm2, %v175_v35 }
 0x1db   :  { %188 = dma.vmem_to_hbm [thread:$0]  %s184_s1, 16, %s186_s21, [#allocation5]  }
 0x1dc   :  { %286 = dma.done.wait [#allocation5], 16  }
 0x1dd   :  { %287 = vsyncadd [#allocation5], 4294967280 }
 0x1de   :  { %193 = vsyncpa [#allocation4], 1 }
 0x1df   :  { %194 = vsyncpa [#allocation7], 1 }
 0x1e0   :  { %195 = vsyncpa [#allocation5], 1 }

</bundles_post_ra>
